<compile_context>
chip_gen: v7x
topology: tpu7x:2x2x1
jax: 0.10.0
libtpu: 0.0.40
codegen_flags: <defaults>
</compile_context>

<pallas_src>
import functools

import jax
import jax.numpy as jnp
from jax import lax
from jax.experimental import pallas as pl
from jax.experimental.pallas import tpu as pltpu

_VMEM_LIMIT = 48 * 1024 * 1024   # <= 64 MiB (v7x physical VMEM); safe on all generations
_BN_EPS = 1e-5


# ------------------------------ small helpers ------------------------------

def _cdiv(a, b):
    return -(-a // b)


def _round_up(x, m):
    return _cdiv(x, m) * m


def _pad_ch(c):
    return max(128, _round_up(c, 128))


def _row_tiling(m):
    """(padded row count, row tile); the tile divides the padded extent, and we try to
    give >=2 M tiles so both v7x TensorCores get work."""
    if m % 256 == 0:
        return m, 256
    mp = _round_up(m, 8)
    if mp > 512:
        mp = _round_up(m, 256)
        return mp, 256
    if mp >= 256 and mp % 16 == 0:
        return mp, mp // 2
    return mp, mp


def _col_tile(np_):
    if np_ <= 512:
        return np_
    return 512 if np_ % 512 == 0 else 256


def _ew_tiles(mp, np_):
    tn = 512 if np_ % 512 == 0 else (256 if np_ % 256 == 0 else np_)
    for tm in (1024, 512, 256, 128, 64, 32, 16, 8):
        if mp % tm == 0:
            return tm, tn
    return mp, tn


# --------------------------- Pallas kernel bodies ---------------------------

def _mm_stats_kernel(a_ref, b_ref, o_ref, stats_ref):
    """Full-K bf16 matmul (f32 MXU accumulation) + fused per-column sum / sum-of-squares."""
    acc = jnp.dot(a_ref[...], b_ref[...], preferred_element_type=jnp.float32)
    o_ref[...] = acc.astype(o_ref.dtype)
    s = jnp.sum(acc, axis=0, keepdims=True)            # (1, tn) column sums
    sq = jnp.sum(acc * acc, axis=0, keepdims=True)     # (1, tn) column sum of squares
    row = lax.broadcasted_iota(jnp.int32, (2, 1), 0)
    stats_ref[...] = jnp.where(row == 0, s, sq)[None, :, :]


def _mm_stats_prologue_kernel(a_ref, b_ref, sc_ref, sh_ref, o_ref, stats_ref,
                              *, tile_m, m_true, mask_rows):
    """Same as above, with the producer's BatchNorm apply + ReLU fused on the A tile."""
    a = a_ref[...].astype(jnp.float32) * sc_ref[...] + sh_ref[...]
    a = jnp.maximum(a, 0.0)
    if mask_rows:
        # Padded M rows would otherwise become relu(shift) != 0 and corrupt the stats.
        rid = lax.broadcasted_iota(jnp.int32, (tile_m, 1), 0) + pl.program_id(1) * tile_m
        a = jnp.where(rid < m_true, a, 0.0)
    acc = jnp.dot(a.astype(jnp.bfloat16), b_ref[...],
                  preferred_element_type=jnp.float32)
    o_ref[...] = acc.astype(o_ref.dtype)
    s = jnp.sum(acc, axis=0, keepdims=True)
    sq = jnp.sum(acc * acc, axis=0, keepdims=True)
    row = lax.broadcasted_iota(jnp.int32, (2, 1), 0)
    stats_ref[...] = jnp.where(row == 0, s, sq)[None, :, :]


def _bn_act_kernel(x_ref, sc_ref, sh_ref, o_ref, *, relu):
    y = x_ref[...].astype(jnp.float32) * sc_ref[...] + sh_ref[...]
    if relu:
        y = jnp.maximum(y, 0.0)
    o_ref[...] = y.astype(o_ref.dtype)


def _bn_res_relu_kernel(x_ref, sc_ref, sh_ref, r_ref, o_ref):
    y = (x_ref[...].astype(jnp.float32) * sc_ref[...] + sh_ref[...]
         + r_ref[...].astype(jnp.float32))
    o_ref[...] = jnp.maximum(y, 0.0).astype(o_ref.dtype)


def _bn2_res_relu_kernel(x_ref, sc_ref, sh_ref, r_ref, scd_ref, shd_ref, o_ref):
    # BN3(conv3) + BN_d(conv_d) + ReLU in one pass (downsample blocks)
    y = (x_ref[...].astype(jnp.float32) * sc_ref[...] + sh_ref[...]
         + r_ref[...].astype(jnp.float32) * scd_ref[...] + shd_ref[...])
    o_ref[...] = jnp.maximum(y, 0.0).astype(o_ref.dtype)


# ------------------------- cached pallas_call factories -------------------------
# (lru_cache + jax.jit => each distinct shape combination is traced/compiled exactly once)

@functools.lru_cache(maxsize=None)
def _matmul_stats_call(mp, kp, np_, tile_m, tile_n, has_prologue, m_true, out_dtype):
    num_i = mp // tile_m
    num_j = np_ // tile_n
    a_spec = pl.BlockSpec((tile_m, kp), lambda j, i: (i, 0))
    # B's block index is constant across the inner (i) axis -> the weight tile is DMA'd
    # once per j and stays VMEM-resident across all M tiles.
    b_spec = pl.BlockSpec((kp, tile_n), lambda j, i: (0, j))
    out_spec = pl.BlockSpec((tile_m, tile_n), lambda j, i: (i, j))
    stats_spec = pl.BlockSpec((1, 2, tile_n), lambda j, i: (i, 0, j))
    if has_prologue:
        vec_spec = pl.BlockSpec((1, kp), lambda j, i: (0, 0))
        kernel = functools.partial(_mm_stats_prologue_kernel, tile_m=tile_m,
                                   m_true=m_true, mask_rows=(mp != m_true))
        in_specs = [a_spec, b_spec, vec_spec, vec_spec]
    else:
        kernel = _mm_stats_kernel
        in_specs = [a_spec, b_spec]
    call = pl.pallas_call(
        kernel,
        grid=(num_j, num_i),
        in_specs=in_specs,
        out_specs=[out_spec, stats_spec],
        out_shape=(jax.ShapeDtypeStruct((mp, np_), out_dtype),
                   jax.ShapeDtypeStruct((num_i, 2, np_), jnp.float32)),
        compiler_params=pltpu.CompilerParams(
            dimension_semantics=("parallel", "parallel"),
            vmem_limit_bytes=_VMEM_LIMIT),
    )
    return jax.jit(call)


@functools.lru_cache(maxsize=None)
def _elementwise_call(mp, np_, variant, relu, out_dtype):
    tm, tn = _ew_tiles(mp, np_)
    mat = pl.BlockSpec((tm, tn), lambda i, j: (i, j))
    vec = pl.BlockSpec((1, tn), lambda i, j: (0, j))
    if variant == "bn":
        kernel = functools.partial(_bn_act_kernel, relu=relu)
        in_specs = [mat, vec, vec]
    elif variant == "bn_res":
        kernel = _bn_res_relu_kernel
        in_specs = [mat, vec, vec, mat]
    else:  # "bn2_res"
        kernel = _bn2_res_relu_kernel
        in_specs = [mat, vec, vec, mat, vec, vec]
    call = pl.pallas_call(
        kernel,
        grid=(mp // tm, np_ // tn),
        in_specs=in_specs,
        out_specs=mat,
        out_shape=jax.ShapeDtypeStruct((mp, np_), out_dtype),
        compiler_params=pltpu.CompilerParams(
            dimension_semantics=("parallel", "parallel"),
            vmem_limit_bytes=_VMEM_LIMIT),
    )
    return jax.jit(call)


def matmul_bn_stats(rows, wm, tile_m, m_true, prologue=None, out_dtype=jnp.bfloat16):
    mp, kp = rows.shape
    np_ = wm.shape[1]
    tile_n = _col_tile(np_)
    has_pro = prologue is not None
    call = _matmul_stats_call(mp, kp, np_, tile_m, tile_n, has_pro,
                              m_true if has_pro else mp, out_dtype)
    if has_pro:
        return call(rows, wm, prologue[0], prologue[1])
    return call(rows, wm)


def bn_act(y, scale, shift, relu, out_dtype=jnp.bfloat16):
    mp, np_ = y.shape
    return _elementwise_call(mp, np_, "bn", bool(relu), out_dtype)(y, scale, shift)


def bn_res_relu(y, scale, shift, r, out_dtype=jnp.bfloat16):
    mp, np_ = y.shape
    return _elementwise_call(mp, np_, "bn_res", True, out_dtype)(y, scale, shift, r)


def bn2_res_relu(y, scale, shift, r, scale_d, shift_d, out_dtype=jnp.bfloat16):
    mp, np_ = y.shape
    return _elementwise_call(mp, np_, "bn2_res", True, out_dtype)(
        y, scale, shift, r, scale_d, shift_d)


# -------------------------- convolution + BN forward --------------------------

def _im2col(x, kh, kw, stride, pad):
    """NHWC im2col. 1x1 convs bypass patch materialization entirely (pure reshape)."""
    n, h, w, c = x.shape
    if kh == 1 and kw == 1 and pad == 0:
        if stride != 1:
            x = x[:, ::stride, ::stride, :]
        n, ho, wo, c = x.shape
        return x.reshape(n * ho * wo, c), n, ho, wo
    # TODO(synk): 3x3/7x7 patches are still materialized in HBM by plain-JAX glue; an
    # in-kernel shifted-window accumulation over (kh, kw) would remove the 9x expansion.
    xp = jnp.pad(x, ((0, 0), (pad, pad), (pad, pad), (0, 0)))
    ho = (h + 2 * pad - kh) // stride + 1
    wo = (w + 2 * pad - kw) // stride + 1
    cols = []
    for di in range(kh):
        for dj in range(kw):
            cols.append(xp[:, di:di + stride * ho:stride,
                           dj:dj + stride * wo:stride, :])
    patches = jnp.concatenate(cols, axis=-1).reshape(n * ho * wo, kh * kw * c)
    return patches, n, ho, wo


def _bn_scale_shift(stats, m_true, layer):
    """Training-mode BatchNorm scale/shift from the fused per-tile sum / sum-of-squares."""
    col_sum = jnp.sum(stats[:, 0, :], axis=0)
    col_sq = jnp.sum(stats[:, 1, :], axis=0)
    inv_n = 1.0 / float(m_true)
    mean = col_sum * inv_n
    var = jnp.maximum(col_sq * inv_n - mean * mean, 0.0)
    rstd = lax.rsqrt(var + _BN_EPS)
    scale = layer["gamma"] * rstd[None, :]
    shift = layer["beta"] - mean[None, :] * scale
    return scale, shift


def conv_stats_spatial(x, layer, out_dtype=jnp.bfloat16):
    """Conv matmul (bf16 pre-BN output rows) + per-channel batch statistics; NHWC input."""
    rows, n, ho, wo = _im2col(x, layer["kh"], layer["kw"], layer["stride"], layer["pad"])
    m, k = rows.shape
    kp, np_ = layer["wm"].shape
    mp, tile_m = _row_tiling(m)
    rows = rows.astype(jnp.bfloat16)
    if mp != m or kp != k:
        rows = jnp.pad(rows, ((0, mp - m), (0, kp - k)))
    y, stats = matmul_bn_stats(rows, layer["wm"], tile_m, m, None, out_dtype)
    scale, shift = _bn_scale_shift(stats, m, layer)
    meta = {"m": m, "mp": mp, "tile_m": tile_m, "n": n, "ho": ho, "wo": wo,
            "cout_p": np_}
    return y, scale, shift, meta


def conv_stats_rows(rows, layer, m_true, tile_m, prologue, out_dtype=jnp.bfloat16):
    """1x1 conv directly on padded pre-BN rows with a fused input BN+ReLU prologue."""
    y, stats = matmul_bn_stats(rows, layer["wm"], tile_m, m_true, prologue, out_dtype)
    scale, shift = _bn_scale_shift(stats, m_true, layer)
    return y, scale, shift


def _rows_to_spatial(rows, meta, cout_p=None):
    c = meta["cout_p"] if cout_p is None else cout_p
    m = meta["m"]
    if rows.shape[0] != m:
        rows = rows[:m]
    return rows.reshape(meta["n"], meta["ho"], meta["wo"], c)


def maxpool_3x3_s2(x):
    # TODO(synk): stem max-pool stays in XLA (lax.reduce_window); single small stem op.
    return lax.reduce_window(x, jnp.asarray(-jnp.inf, x.dtype), lax.max,
                             (1, 3, 3, 1), (1, 2, 2, 1),
                             ((0, 0), (1, 1), (1, 1), (0, 0)))


# ------------------------------ parameter init ------------------------------

def _conv_weight_init(key, cout, cin, kh, kw):
    fan_out = cout * kh * kw
    std = (2.0 / fan_out) ** 0.5
    return std * jax.random.normal(key, (cout, cin, kh, kw), jnp.float32)


def _prep_conv(w_oihw, cin_feed, stride, pad):
    """Pre-transpose / pad / cast a conv weight once at init:
    (Cout,Cin,kh,kw) -> bf16 (round_up(kh*kw*cin_feed,128), round_up(Cout,128)),
    plus zero-padded BatchNorm affine parameters."""
    cout, cin, kh, kw = w_oihw.shape
    cout_p = _pad_ch(cout)
    wt = jnp.transpose(w_oihw, (2, 3, 1, 0))                       # (kh, kw, cin, cout)
    wt = jnp.pad(wt, ((0, 0), (0, 0), (0, cin_feed - cin), (0, cout_p - cout)))
    wm = wt.reshape(kh * kw * cin_feed, cout_p)
    kp = _round_up(wm.shape[0], 128)
    if kp != wm.shape[0]:
        wm = jnp.pad(wm, ((0, kp - wm.shape[0]), (0, 0)))
    gamma = jnp.pad(jnp.ones((1, cout), jnp.float32), ((0, 0), (0, cout_p - cout)))
    beta = jnp.zeros((1, cout_p), jnp.float32)
    return {"wm": wm.astype(jnp.bfloat16), "gamma": gamma, "beta": beta,
            "kh": kh, "kw": kw, "stride": stride, "pad": pad, "cout": cout}


def _init_bottleneck(key, inplanes, planes, stride, downsample):
    k1, k2, k3, kd = jax.random.split(key, 4)
    inp_p = _pad_ch(inplanes)
    mid_p = _pad_ch(planes)
    blk = {
        "c1": _prep_conv(_conv_weight_init(k1, planes, inplanes, 1, 1), inp_p, 1, 0),
        "c2": _prep_conv(_conv_weight_init(k2, planes, planes, 3, 3), mid_p, stride, 1),
        "c3": _prep_conv(_conv_weight_init(k3, planes * 4, planes, 1, 1), mid_p, 1, 0),
    }
    if downsample:
        blk["cd"] = _prep_conv(_conv_weight_init(kd, planes * 4, inplanes, 1, 1),
                               inp_p, stride, 0)
    return blk


def init_resnet50(key):
    keys = jax.random.split(key, 5)
    params = {"conv1": _prep_conv(_conv_weight_init(keys[0], 64, 3, 7, 7), 3, 2, 3)}
    inplanes = 64
    layers = []
    for li, (planes, blocks, stride) in enumerate(
            [(64, 3, 1), (128, 4, 2), (256, 6, 2), (512, 3, 2)]):
        bkeys = jax.random.split(keys[li + 1], blocks)
        blk_params = []
        for bi in range(blocks):
            s = stride if bi == 0 else 1
            ds = (bi == 0) and (s != 1 or inplanes != planes * 4)
            blk_params.append(_init_bottleneck(bkeys[bi], inplanes, planes, s, ds))
            inplanes = planes * 4
        layers.append(blk_params)
    params["layers"] = layers
    return params


def init_encoder(key, latent_dim):
    # TODO(synk): pretrained torchvision weights (pretrain=True) cannot be loaded in this
    # self-contained script; backbone params are He-initialized and BatchNorm uses batch
    # statistics (PyTorch default training mode); running-stat buffers are not tracked.
    kb, kw_ = jax.random.split(key, 2)
    backbone = init_resnet50(kb)
    cf = 2048  # resnet50 fc.in_features
    dr_w = _conv_weight_init(kw_, latent_dim, cf, 1, 1)
    # NOTE: the Conv2d bias of dim_reduction cancels exactly under the following
    # training-mode BatchNorm2d (a per-channel constant shifts the batch mean by the same
    # constant), so it is omitted from the forward pass without changing the output.
    dr = _prep_conv(dr_w, _pad_ch(cf), 1, 0)
    return {"backbone": backbone, "dr": dr, "latent_dim": latent_dim}


# ------------------------------- model forward -------------------------------

def bottleneck_fwd(x, blk):
    # conv1 (1x1) + BN1 stats; BN1+ReLU applied explicitly (conv2's spatial zero padding
    # must see true zeros, so this BN cannot be deferred into conv2's matmul).
    y1, sc1, sh1, meta1 = conv_stats_spatial(x, blk["c1"])
    a1 = _rows_to_spatial(bn_act(y1, sc1, sh1, relu=True), meta1)
    # conv2 (3x3) + BN2 stats; BN2+ReLU is deferred into conv3's fused A-tile prologue.
    y2, sc2, sh2, meta2 = conv_stats_spatial(a1, blk["c2"])
    # conv3 (1x1) consuming conv2's pre-BN rows with a fused BN2+ReLU prologue.
    y3, sc3, sh3 = conv_stats_rows(y2, blk["c3"], meta2["m"], meta2["tile_m"],
                                   (sc2, sh2))
    cout_p = blk["c3"]["wm"].shape[1]
    if "cd" in blk:
        # Downsample conv; its BatchNorm is folded into the final combine kernel.
        yd, scd, shd, _ = conv_stats_spatial(x, blk["cd"])
        out = bn2_res_relu(y3, sc3, sh3, yd, scd, shd)
    else:
        m2, mp2 = meta2["m"], meta2["mp"]
        r = x.reshape(m2, cout_p)
        if mp2 != m2:
            r = jnp.pad(r, ((0, mp2 - m2), (0, 0)))
        out = bn_res_relu(y3, sc3, sh3, r)
    return _rows_to_spatial(out, meta2, cout_p=cout_p)


def resnet50_features(x, params):
    # torchvision resnet50 children()[:-2]: conv1, bn1, relu, maxpool, layer1..layer4
    y, sc, sh, meta = conv_stats_spatial(x, params["conv1"])
    a = _rows_to_spatial(bn_act(y, sc, sh, relu=True), meta)
    x = maxpool_3x3_s2(a)
    for layer in params["layers"]:
        for blk in layer:
            x = bottleneck_fwd(x, blk)
    return x  # (N, h', w', 2048) with channels 128-aligned


def encoder_forward(x_bschw, params):
    # x: (batch, seq, c, h, w) — same axis convention as the PyTorch module
    b, s, c, h, w = x_bschw.shape
    x = x_bschw.reshape(b * s, c, h, w)
    x = jnp.transpose(x, (0, 2, 3, 1))                     # NCHW -> NHWC
    x = resnet50_features(x, params["backbone"])
    # dim_reduction: Conv2d(2048, latent, 1) + BatchNorm2d(latent) (train-mode stats),
    # computed with the output-channel dim padded to 128 (lane-dense stores), then sliced.
    y, sc, sh, meta = conv_stats_spatial(x, params["dr"])
    y = _rows_to_spatial(bn_act(y, sc, sh, relu=False, out_dtype=jnp.float32), meta)
    y = y[..., :params["latent_dim"]]
    n, ho, wo, latent = y.shape
    y = jnp.transpose(y, (0, 3, 1, 2))                     # NHWC -> NCHW
    return y.reshape(b, s, latent, ho, wo)


if __name__ == "__main__":
    key = jax.random.PRNGKey(0)
    k_params, k_x = jax.random.split(key)
    latent_dim = 32
    params = init_encoder(k_params, latent_dim)

    B, S, C, H, W = 2, 4, 3, 16, 16
    x = jax.random.normal(k_x, (B, S, C, H, W), jnp.float32)

    out = encoder_forward(x, params)
    out = jax.block_until_ready(out)

    assert out.shape == (B, S, latent_dim, 1, 1), out.shape
    assert bool(jnp.all(jnp.isfinite(out)))
    print("KERNEL_OK")
</pallas_src>

<mosaic_0001>
module attributes {stable_mosaic.version = 11 : i64} {
  func.func @_mm_stats_kernel(%arg0: i32, %arg1: i32, %arg2: memref<256x256xbf16, #tpu.memory_space<vmem>>, %arg3: memref<256x128xbf16, #tpu.memory_space<vmem>>, %arg4: memref<256x128xbf16, #tpu.memory_space<vmem>>, %arg5: memref<1x2x128xf32, #tpu.memory_space<vmem>>) attributes {dimension_semantics = [#tpu.dimension_semantics<parallel>, #tpu.dimension_semantics<parallel>], iteration_bounds = array<i64: 1, 2>, scalar_prefetch = 0 : i64, scratch_operands = 0 : i64, tpu.core_type = #tpu.core_type<tc>, window_params = [{transform_indices = @transform_0, window_bounds = array<i64: 256, 256>}, {transform_indices = @transform_1, window_bounds = array<i64: 256, 128>}, {transform_indices = @transform_2, window_bounds = array<i64: 256, 128>}, {transform_indices = @transform_3, window_bounds = array<i64: 1, 2, 128>}]} {
    %c0 = arith.constant 0 : index
    %c0_0 = arith.constant 0 : index
    %0 = vector.load %arg2[%c0, %c0_0] : memref<256x256xbf16, #tpu.memory_space<vmem>>, vector<256x256xbf16>
    %c0_1 = arith.constant 0 : index
    %c0_2 = arith.constant 0 : index
    %1 = vector.load %arg3[%c0_1, %c0_2] : memref<256x128xbf16, #tpu.memory_space<vmem>>, vector<256x128xbf16>
    %cst = arith.constant dense<0.000000e+00> : vector<256x128xf32>
    %2 = tpu.matmul %0, %1, %cst {dimension_numbers = #tpu.dot_dimension_numbers<[1], [0], [0], [1], [0, 0, 1, 1], [], []>} : vector<256x256xbf16>, vector<256x128xbf16>, vector<256x128xf32> -> vector<256x128xf32>
    %3 = arith.truncf %2 : vector<256x128xf32> to vector<256x128xbf16>
    %c0_3 = arith.constant 0 : index
    %c0_4 = arith.constant 0 : index
    %4 = vector.load %arg4[%c0_3, %c0_4] : memref<256x128xbf16, #tpu.memory_space<vmem>>, vector<256x128xbf16>
    tpu.vector_store %arg4[%c0_3, %c0_4], %3 {strides = array<i32>} : memref<256x128xbf16, #tpu.memory_space<vmem>>, vector<256x128xbf16>,
    %cst_5 = arith.constant dense<0.000000e+00> : vector<128xf32>
    %5 = vector.multi_reduction <add>, %2, %cst_5 [0] : vector<256x128xf32> to vector<128xf32>
    %6 = vector.shape_cast %5 : vector<128xf32> to vector<1x128xf32>
    %7 = arith.mulf %2, %2 : vector<256x128xf32>
    %cst_6 = arith.constant dense<0.000000e+00> : vector<128xf32>
    %8 = vector.multi_reduction <add>, %7, %cst_6 [0] : vector<256x128xf32> to vector<128xf32>
    %9 = vector.shape_cast %8 : vector<128xf32> to vector<1x128xf32>
    %10 = tpu.iota {dimensions = array<i32: 0>} : vector<2x1xi32>
    %c0_i32 = arith.constant 0 : i32
    %11 = vector.broadcast %c0_i32 : i32 to vector<2x1xi32>
    %12 = arith.cmpi eq, %10, %11 : vector<2x1xi32>
    %13 = vector.shape_cast %12 : vector<2x1xi1> to vector<2x1xi1>
    %14 = vector.broadcast %13 : vector<2x1xi1> to vector<2x128xi1>
    %15 = vector.shape_cast %6 : vector<1x128xf32> to vector<1x128xf32>
    %16 = vector.broadcast %15 : vector<1x128xf32> to vector<2x128xf32>
    %17 = vector.shape_cast %9 : vector<1x128xf32> to vector<1x128xf32>
    %18 = vector.broadcast %17 : vector<1x128xf32> to vector<2x128xf32>
    %19 = arith.select %14, %16, %18 : vector<2x128xi1>, vector<2x128xf32>
    %20 = vector.shape_cast %19 : vector<2x128xf32> to vector<1x2x128xf32>
    %c0_7 = arith.constant 0 : index
    %c0_8 = arith.constant 0 : index
    %c0_9 = arith.constant 0 : index
    %21 = vector.load %arg5[%c0_7, %c0_8, %c0_9] : memref<1x2x128xf32, #tpu.memory_space<vmem>>, vector<1x2x128xf32>
    tpu.vector_store %arg5[%c0_7, %c0_8, %c0_9], %20 {strides = array<i32>} : memref<1x2x128xf32, #tpu.memory_space<vmem>>, vector<1x2x128xf32>,
    return
  }
  func.func @transform_0(%arg0: i32, %arg1: i32) -> (i32, i32) {
    %c0_i32 = arith.constant 0 : i32
    %c0_i32_0 = arith.constant 0 : i32
    return %arg1, %c0_i32 : i32, i32
  }
  func.func @transform_1(%arg0: i32, %arg1: i32) -> (i32, i32) {
    %c0_i32 = arith.constant 0 : i32
    %c0_i32_0 = arith.constant 0 : i32
    return %c0_i32, %arg0 : i32, i32
  }
  func.func @transform_2(%arg0: i32, %arg1: i32) -> (i32, i32) {
    %c0_i32 = arith.constant 0 : i32
    return %arg1, %arg0 : i32, i32
  }
  func.func @transform_3(%arg0: i32, %arg1: i32) -> (i32, i32, i32) {
    %c0_i32 = arith.constant 0 : i32
    %c0_i32_0 = arith.constant 0 : i32
    return %arg1, %c0_i32, %arg0 : i32, i32, i32
  }
}

</mosaic_0001>

<bundles_post_ra>
// kernel: tpu_custom_call.1
= control target key start
LH: loop header
LB: loop body
LE: loop exit
PB: predicated region body
PF: predicated region fallthrough
CT: control target
= control target key end

     0   :  { %9 = vsyncpa [#allocation3], 0  ;;  %s2273_s0 = inlined_call_operand.hbm [shape: bf16[512,256], index: 0, kind: input, shape index: {}]   ;;  %s2274_s1 = inlined_call_operand.hbm [shape: bf16[256,128], index: 1, kind: input, shape index: {}]   ;;  %s2275_s2 = inlined_call_operand.hbm [shape: bf16[512,128], index: 2, kind: output, shape index: {0}]   ;;  %s2276_s3 = inlined_call_operand.hbm [shape: f32[2,2,128], index: 3, kind: output, shape index: {1}]  }
   0x1   :  { %11 = vsyncpa [#allocation3 + $0x1], 0 }
   0x2   :  { %12 = vsyncpa [#allocation6], 0 }
   0x3   :  { %13 = vsyncpa [#allocation4], 0 }
   0x4   :  { %15 = vsyncpa [#allocation4 + $0x1], 0 }
   0x5   :  { %16 = vsyncpa [#allocation9], 0 }
   0x6   :  { %18 = vsyncpa [#allocation9 + $0x1], 0  ;;  %s1873_s12 = smov 0   ;;  %s1875_s13 = smov 0  }
   0x7   :  { %s1877_s14 = smov 0   ;;  %s1879_s15 = smov 0  }
   0x8   :  { %s1881_s16 = smov 0   ;;  %s1883_s17 = smov 0  }
   0x9 LB: > { %s1158_s18 = sadd.s32 4294967295, %s1841_s17   ;;  %s1159_s19 = sadd.s32 4294967294, %s1841_s17   ;;  %s1841_s17 = sphi %s1883_s17, %s24_s17   ;;  %s1837_s16 = sphi %s1881_s16, %s2300_s16   ;;  %s1833_s15 = sphi %s1879_s15, %s2299_s15   ;;  %s1829_s14 = sphi %s1877_s14, %s2298_s14   ;;  %s1825_s13 = sphi %s1875_s13, %s2297_s13   ;;  %s1821_s12 = sphi %s1873_s12, %s2296_s12  }
   0xa   : > { %p56_p0 = scmp.ne.s32.totalorder %s1825_s13, %s1821_s12  ;;  %p1907_p1 = scmp.eq.s32.totalorder %s1158_s18, 0 }
   0xb   : > { %p1911_p2 = scmp.eq.s32.totalorder %s1158_s18, 1  ;;  %p114_p3 = scmp.eq.s32.totalorder %s1159_s19, 1 }
   0xc   : > { %s2281_s20 = scalar_select %p1907_p1, 1, 0 }
   0xd   : > { %s2282_s21 = scalar_select %p1911_p2, 1, 0 }
   0xe   : > { %p1917_p4 = por %p1907_p1, %p56_p0  ;;  %p1160_p5 = scmp.ge.s32.totalorder %s1841_s17, 1 }
   0xf   : > { %p1922_p6 = por %p114_p3, %p56_p0  ;;  %p149_p7 = scmp.lt.s32.totalorder %s1841_s17, 3 }
  0x10   : > { %s2283_s22 = scalar_select %p1917_p4, 1, 0 }
  0x11   : > { %s2284_s23 = scalar_select %p1922_p6, 1, 0 }
  0x12   : > { %p1927_p8 = pnand %p1160_p5, %p149_p7  ;;  %s1843_s25 = smov [#allocation5]  }
  0x13   : > { %s163_s26 = sshll.u32 %s1843_s25, 4  ;;  %s33_s28 = sadd.s32 1, %s1837_s16  ;;  %s164_s26 = int_to_ptr.vmem [resolvable:$true] %s163_s26 }
  0x14   : > { %s2285_s24 = scalar_select %p1927_p8, 1, 0 }
  0x15   : > { %p1527_p9 = pneg %p1927_p8  ;;  %s1665_s4 = scalar_lea.hbm %s2274_s1, 2048 }
  0x16   : > { %p1666_p12 = scmp.ne.s32.totalorder %s2274_s1, %s1665_s4  ;;  %p1672_p5 = scmp.lt.u32.totalorder %s1665_s4, %s2274_s1 }
  0x17   : > { %p1936_p11 = pnand %p1527_p9, %p1907_p1 }
  0x19   : > { %p1667_p13 = pneg %p1936_p11 }
  0x1b   : > { %p1668_p0 = pnand %p1667_p13, %p1666_p12 }
  0x1d   : > { %p1669_p3 = pneg %p1668_p0 }
  0x1f   : > { %p1674_p7 = pnand %p1672_p5, %p1669_p3 }
  0x21   : > { %1677 = shalt.err (!%p1674_p7)
}
  0x22   : > { %s1678_s9 = scalar_lea.vmem %s164_s26, 2048  ;;  %p1686_p1 = scmp.lt.s32.totalorder %s164_s26, %s164_s26 }
  0x23   : > { %p1679_p9 = scmp.ne.s32.totalorder %s164_s26, %s1678_s9  ;;  %p1687_p4 = scmp.lt.s32.totalorder %s1678_s9, %s1678_s9 }
  0x25   : > { %p1681_p10 = pnand %p1679_p9, %p1667_p13  ;;  %p1688_p8 = por %p1687_p4, %p1686_p1 }
  0x27   : > { %p1682_p6 = pneg %p1681_p10 }
  0x29   : > { %p1689_p2 = pnand %p1688_p8, %p1682_p6 }
  0x2b   : > { %1692 = shalt.err (!%p1689_p2)
}
  0x2c   : > { %s1844_s10 = smov 64   ;;  %s1845_s11 = smov 4  }
  0x2d   : > { %1530 = dma.hbm_to_vmem [thread:$0]  (!%p1936_p11), %s2274_s1, 2048, %s164_s26, [#allocation6], %s1844_s10, %s1844_s10, %s1845_s11  }
  0x2e   : > { %p34_p1 = scmp.ge.s32.totalorder %s33_s28, 2  ;;  %s43_s25 = sadd.s32 1, %s1829_s14 }
  0x2f   : > { %p50_p2 = scmp.ne.s32.totalorder %s1829_s14, %s1825_s13  ;;  %p51_p4 = scmp.eq.s32.totalorder %s1841_s17, 0 }
  0x30   : > { %s2302_s28 = smov (%p34_p1, %s33_s28), 0  ;;  %p2288_p8 = scmp.ne.s32.totalorder %s2282_s21, 0 }
  0x31   : > { %p1963_p6 = por %p51_p4, %p50_p2  ;;  %s40_s27 = ssub.s32 %s1837_s16, %s2302_s28 }
  0x32   : > { %p1969_p10 = por %p2288_p8, %p50_p2  ;;  %p1543_p12 = scmp.lt.s32.totalorder %s1841_s17, 2 }
  0x33   : > { %p41_p11 = scmp.eq.s32.totalorder %s40_s27, 0  ;;  %s177_s26 = sand.u32 1, %s1829_s14  }
  0x34   : > { %s1163_s4 = sshll.u32 %s177_s26, 8  ;;  %s1260_s6 = sshll.u32 %s1837_s16, 12 }
  0x35   : > { %s1978_s5 = scalar_select %p41_p11, %s1829_s14, %s43_s25  }
  0x36   : > { %s1984_s9 = scalar_lea.hbm %s2273_s0, %s1260_s6  ;;  %s181_s21 = scalar_lea.vmem [#allocation2], %s1163_s4 }
  0x37   : > { %s189_s10 = sshll.u32 %s181_s21, 4  ;;  %p1990_p13 = pnand %p1543_p12, %p1963_p6  ;;  %s1986_s10 = int_to_ptr.vmem [resolvable:$true] %s189_s10 }
  0x38   : > { %s1994_s18 = scalar_lea.sflag [#allocation3], %s177_s26  ;;  %s1693_s19 = scalar_lea.hbm %s1984_s9, 4096 }
  0x39   : > { %p1694_p0 = scmp.ne.s32.totalorder %s1984_s9, %s1693_s19  ;;  %p1695_p3 = pneg %p1990_p13 }
  0x3a   : > { %s1698_s29 = scalar_lea.hbm %s2273_s0, 8192  ;;  %p1699_p9 = scmp.lt.u32.totalorder %s1984_s9, %s2273_s0 }
  0x3b   : > { %p1696_p5 = pnand %p1695_p3, %p1694_p0  ;;  %p1700_p1 = scmp.lt.u32.totalorder %s1698_s29, %s1693_s19 }
  0x3c   : > { %p1702_p4 = scmp.lt.u32.totalorder %s1693_s19, %s1984_s9 }
  0x3d   : > { %p1697_p7 = pneg %p1696_p5  ;;  %p1701_p2 = por %p1700_p1, %p1699_p9 }
  0x3f   : > { %p1703_p6 = por %p1702_p4, %p1701_p2 }
  0x41   : > { %p1704_p8 = pnand %p1703_p6, %p1697_p7 }
  0x43   : > { %1707 = shalt.err (!%p1704_p8)
}
  0x44   : > { %s1708_s26 = scalar_lea.vmem %s1986_s10, 4096  ;;  %s1846_s7 = smov [#allocation2]  }
  0x45   : > { %p1709_p12 = scmp.ne.s32.totalorder %s1986_s10, %s1708_s26  ;;  %s1713_s8 = sshll.u32 %s1846_s7, 4  ;;  %s1714_s8 = int_to_ptr.vmem [resolvable:$false] %s1713_s8 }
  0x46   : > { %s1715_s21 = scalar_lea.vmem %s1714_s8, 8192  ;;  %p1716_p5 = scmp.lt.s32.totalorder %s1986_s10, %s1714_s8 }
  0x47   : > { %p1711_p11 = pnand %p1709_p12, %p1695_p3  ;;  %p1717_p9 = scmp.lt.s32.totalorder %s1715_s21, %s1708_s26 }
  0x49   : > { %p1712_p0 = pneg %p1711_p11  ;;  %p1718_p1 = por %p1717_p9, %p1716_p5 }
  0x4b   : > { %p1719_p2 = pnand %p1718_p1, %p1712_p0 }
  0x4d   : > { %1722 = shalt.err (!%p1719_p2)
}
  0x4e   : > { %s1847_s19 = smov 128   ;;  %s1848_s25 = smov 8  }
  0x4f   : > { %1534 = dma.hbm_to_vmem [thread:$0]  (!%p1990_p13), %s1984_s9, 4096, %s1986_s10, %s1994_s18, %s1847_s19, %s1847_s19, %s1848_s25  }
  0x50   : > { %p2291_p3 = scmp.ne.s32.totalorder %s2285_s24, 0 }
  0x51   : > { %s2025_s27 = sand.u32 (!%p2291_p3), 1, %s1825_s13   ;;  %p2292_p7 = scmp.ne.s32.totalorder (!%p2291_p3), %s2283_s22, 0 }
  0x52   : > { %201 = sbr.rel (%p2291_p3) target bundleno = 473 (0x1d9), region = 28  ;;  %s1168_s29 = sshll.u32 (!%p2291_p3), %s2025_s27, 8 }
  0x53   : > { %s204_s4 = scalar_lea.sflag (!%p2291_p3), [#allocation3], %s2025_s27  ;;  %s2029_s6 = scalar_lea.vmem (!%p2291_p3), [#allocation2], %s1168_s29 }
  0x59   : > { %1804 = dma.done.wait (%p2292_p7), %s204_s4, 4096  }
  0x5a   : > { %1806 = vsyncadd (%p2292_p7), %s204_s4, 4294963200  ;;  %p2293_p13 = scmp.ne.s32.totalorder %s2281_s20, 0 }
  0x5c   : > { %1808 = dma.done.wait (%p2293_p13), [#allocation6], 2048  }
  0x5d   : > { %1810 = vsyncadd (%p2293_p13), [#allocation6], 4294965248  ;;  %v1601_v0 = vld [vmem:[#allocation5 + $0x40] sm:$0xff]   ;;  %v1603_v2 = vld [vmem:[#allocation5 + $0x48] sm:$0xff]   ;;  %s1170_s20 = sshll.u32 %s2025_s27, 7  ;;  %s1293_s24 = sshll.u32 %s1833_s15, 11 }
  0x5e   : > { %v1602_v1 = vld [vmem:[#allocation5] sm:$0xff]   ;;  %1389 = vmatprep.subr.bf16.mxu0 %v1601_v0  ;;  %1501 = vmatprep.subr.bf16.mxu1 %v1601_v0  ;;  %v1604_v3 = vld [vmem:[#allocation5 + $0x8] sm:$0xff]   ;;  %v1605_v4 = vld [vmem:[#allocation5 + $0x50] sm:$0xff]   ;;  %s2078_s22 = scalar_lea.vmem [#allocation7], %s1170_s20  ;;  %s2139_s18 = scalar_lea.hbm %s2275_s2, %s1293_s24 }
  0x5f   : > { %1390 = vmatpush3.bf16.msra.mxu0 %v1602_v1  ;;  %1509 = vmatpush3.bf16.msra.mxu1 %v1602_v1  ;;  %v1606_v5 = vld [vmem:[#allocation5 + $0x10] sm:$0xff]   ;;  %v1607_v6 = vld [vmem:[#allocation5 + $0x58] sm:$0xff]   ;;  %v1609_v8 = vld [vmem:[#allocation5 + $0x60] sm:$0xff]   ;;  %s1016_s9 = sshll.u32 %s2078_s22, 4  ;;  %s997_s26 = scalar_lea.sflag [#allocation4], %s2025_s27  ;;  %s2141_s9 = int_to_ptr.vmem [resolvable:$true] %s1016_s9 }
  0x60   : > { %1391 = vmatprep.subr.bf16.mxu0 %v1603_v2  ;;  %1502 = vmatprep.subr.bf16.mxu1 %v1603_v2  ;;  %v1608_v7 = vld [vmem:[#allocation5 + $0x18] sm:$0xff]   ;;  %v1610_v9 = vld [vmem:[#allocation5 + $0x20] sm:$0xff]   ;;  %v1611_v10 = vld [vmem:[#allocation5 + $0x68] sm:$0xff]   ;;  %s1723_s7 = scalar_lea.vmem %s2141_s9, 2048  ;;  %s1849_s8 = smov [#allocation7]  }
  0x61   : > { %v1619_v11 = vld [vmem:[%s2029_s6 + $0x4] ss:$8 sps:$4 sm:$0xff]   ;;  %v1613_v13 = vld [vmem:[#allocation5 + $0x70] sm:$0xff]   ;;  %v1615_v16 = vld [vmem:[#allocation5 + $0x78] sm:$0xff]   ;;  %p1724_p4 = scmp.ne.s32.totalorder %s2141_s9, %s1723_s7  ;;  %s1727_s21 = sshll.u32 %s1849_s8, 4  ;;  %s1728_s21 = int_to_ptr.vmem [resolvable:$false] %s1727_s21 }
  0x62   : > { %v1612_v12 = vld [vmem:[#allocation5 + $0x28] sm:$0xff]   ;;  %594 = vmatprep.mubr.bf16.mxu0 %v1619_v11  ;;  %v1614_v15 = vld [vmem:[#allocation5 + $0x30] sm:$0xff]   ;;  %v1616_v17 = vld [vmem:[#allocation5 + $0x38] sm:$0xff]   ;;  %s1729_s19 = scalar_lea.vmem %s1728_s21, 4096  ;;  %p1730_p12 = scmp.lt.s32.totalorder %s2141_s9, %s1728_s21 }
  0x63   : > { %1392 = vmatpush3.bf16.msra.mxu0 %v1604_v3  ;;  %1510 = vmatpush3.bf16.msra.mxu1 %v1604_v3  ;;  %v1631_v14 = vld [vmem:[%s2029_s6 + $0x84] ss:$8 sps:$4 sm:$0xff]   ;;  %v1617_v18 = vld [vmem:[%s2029_s6] ss:$8 sps:$4 sm:$0xff]   ;;  %v1620_v19 = vld [vmem:[%s2029_s6 + $0x14] ss:$8 sps:$4 sm:$0xff]   ;;  %p1725_p6 = pnand %p1724_p4, %p1969_p10  ;;  %p1731_p11 = scmp.lt.s32.totalorder %s1729_s19, %s1723_s7 }
  0x64   : > { %1393 = vmatprep.subr.bf16.mxu0 %v1605_v4  ;;  %1503 = vmatprep.subr.bf16.mxu1 %v1605_v4  ;;  %v1629_v20 = vld [vmem:[%s2029_s6 + $0x80] ss:$8 sps:$4 sm:$0xff]   ;;  %v1635_v21 = vld [vmem:[%s2029_s6 + $0x94] ss:$8 sps:$4 sm:$0xff]   ;;  %v1622_v22 = vld [vmem:[%s2029_s6 + $0x10] ss:$8 sps:$4 sm:$0xff]  }
  0x65   : > { %658 = vmatprep.mubr.bf16.mxu1 %v1631_v14  ;;  %v1623_v23 = vld [vmem:[%s2029_s6 + $0x24] ss:$8 sps:$4 sm:$0xff]   ;;  %v1637_v24 = vld [vmem:[%s2029_s6 + $0x90] ss:$8 sps:$4 sm:$0xff]   ;;  %v1625_v26 = vld [vmem:[%s2029_s6 + $0x20] ss:$8 sps:$4 sm:$0xff]   ;;  %p1726_p8 = pneg %p1725_p6  ;;  %p1732_p0 = por %p1731_p11, %p1730_p12 }
  0x66   : > { %v1641_v25 = vld [vmem:[%s2029_s6 + $0xa4] ss:$8 sps:$4 sm:$0xff]   ;;  %v1626_v27 = vld [vmem:[%s2029_s6 + $0x34] ss:$8 sps:$4 sm:$0xff]   ;;  %v1643_v28 = vld [vmem:[%s2029_s6 + $0xa0] ss:$8 sps:$4 sm:$0xff]  }
  0x67   : > { %1394 = vmatpush3.bf16.msra.mxu0 %v1606_v5  ;;  %1511 = vmatpush3.bf16.msra.mxu1 %v1606_v5  ;;  %v1647_v29 = vld [vmem:[%s2029_s6 + $0xb4] ss:$8 sps:$4 sm:$0xff]   ;;  %v1628_v30 = vld [vmem:[%s2029_s6 + $0x30] ss:$8 sps:$4 sm:$0xff]   ;;  %v1632_v31 = vld [vmem:[%s2029_s6 + $0x44] ss:$8 sps:$4 sm:$0xff]   ;;  %p1733_p5 = pnand %p1732_p0, %p1726_p8 }
  0x68   : > { %1395 = vmatprep.subr.bf16.mxu0 %v1607_v6  ;;  %1504 = vmatprep.subr.bf16.mxu1 %v1607_v6  ;;  %v1649_v32 = vld [vmem:[%s2029_s6 + $0xb0] ss:$8 sps:$4 sm:$0xff]   ;;  %v1653_v33 = vld [vmem:[%s2029_s6 + $0xc4] ss:$8 sps:$4 sm:$0xff]   ;;  %v1634_v34 = vld [vmem:[%s2029_s6 + $0x40] ss:$8 sps:$4 sm:$0xff]  }
  0x69   : > { %v1638_v35 = vld [vmem:[%s2029_s6 + $0x54] ss:$8 sps:$4 sm:$0xff]   ;;  %v1655_v36 = vld [vmem:[%s2029_s6 + $0xc0] ss:$8 sps:$4 sm:$0xff]   ;;  %v1640_v38 = vld [vmem:[%s2029_s6 + $0x50] ss:$8 sps:$4 sm:$0xff]  }
  0x6a   : > { %v1656_v37 = vld [vmem:[%s2029_s6 + $0xd4] ss:$8 sps:$4 sm:$0xff]   ;;  %v1644_v39 = vld [vmem:[%s2029_s6 + $0x64] ss:$8 sps:$4 sm:$0xff]   ;;  %v1658_v40 = vld [vmem:[%s2029_s6 + $0xd0] ss:$8 sps:$4 sm:$0xff]  }
  0x6b   : > { %1396 = vmatpush3.bf16.msra.mxu0 %v1608_v7  ;;  %1512 = vmatpush3.bf16.msra.mxu1 %v1608_v7  ;;  %v1659_v41 = vld [vmem:[%s2029_s6 + $0xe4] ss:$8 sps:$4 sm:$0xff]   ;;  %v1646_v42 = vld [vmem:[%s2029_s6 + $0x60] ss:$8 sps:$4 sm:$0xff]   ;;  %v1650_v43 = vld [vmem:[%s2029_s6 + $0x74] ss:$8 sps:$4 sm:$0xff]  }
  0x6c   : > { %1397 = vmatprep.subr.bf16.mxu0 %v1609_v8  ;;  %1505 = vmatprep.subr.bf16.mxu1 %v1609_v8  ;;  %v1661_v44 = vld [vmem:[%s2029_s6 + $0xe0] ss:$8 sps:$4 sm:$0xff]   ;;  %v1662_v45 = vld [vmem:[%s2029_s6 + $0xf4] ss:$8 sps:$4 sm:$0xff]   ;;  %v1652_v46 = vld [vmem:[%s2029_s6 + $0x70] ss:$8 sps:$4 sm:$0xff]  }
  0x6d   : > { %v1664_v47 = vld [vmem:[%s2029_s6 + $0xf0] ss:$8 sps:$4 sm:$0xff]  }
  0x6f   : > { %1398 = vmatpush3.bf16.msra.mxu0 %v1610_v9  ;;  %1513 = vmatpush3.bf16.msra.mxu1 %v1610_v9 }
  0x70   : > { %1399 = vmatprep.subr.bf16.mxu0 %v1611_v10  ;;  %1506 = vmatprep.subr.bf16.mxu1 %v1611_v10 }
  0x73   : > { %1400 = vmatpush3.bf16.msra.mxu0 %v1612_v12  ;;  %1514 = vmatpush3.bf16.msra.mxu1 %v1612_v12 }
  0x74   : > { %1401 = vmatprep.subr.bf16.mxu0 %v1613_v13  ;;  %1507 = vmatprep.subr.bf16.mxu1 %v1613_v13 }
  0x77   : > { %1402 = vmatpush3.bf16.msra.mxu0 %v1614_v15  ;;  %1515 = vmatpush3.bf16.msra.mxu1 %v1614_v15 }
  0x78   : > { %1403 = vmatprep.subr.bf16.mxu0 %v1615_v16  ;;  %1508 = vmatprep.subr.bf16.mxu1 %v1615_v16 }
  0x7b   : > { %1404 = vmatpush3.bf16.msra.mxu0 %v1616_v17  ;;  %1516 = vmatpush3.bf16.msra.mxu1 %v1616_v17 }
  0x7e   : > { %595 = vmatmul.mubr.bf16.vlgmr.msra.gmra.mrb[0].mxu0 %v1617_v18  ;;  %659 = vmatmul.mubr.bf16.vlgmr.msra.gmra.mrb[0].mxu1 %v1629_v20 }
  0x7f   : > { %602 = vmatprep.mubr.bf16.mxu0 %v1620_v19  ;;  %666 = vmatprep.mubr.bf16.mxu1 %v1635_v21 }
  0x86   : > { %603 = vmatmul.mubr.bf16.gmra.mrb[4].mxu0 %v1622_v22  ;;  %667 = vmatmul.mubr.bf16.gmra.mrb[4].mxu1 %v1637_v24 }
  0x87   : > { %610 = vmatprep.mubr.bf16.mxu0 %v1623_v23  ;;  %674 = vmatprep.mubr.bf16.mxu1 %v1641_v25 }
  0x8e   : > { %611 = vmatmul.mubr.bf16.gmra.mrb[8].mxu0 %v1625_v26  ;;  %675 = vmatmul.mubr.bf16.gmra.mrb[8].mxu1 %v1643_v28 }
  0x8f   : > { %618 = vmatprep.mubr.bf16.mxu0 %v1626_v27  ;;  %682 = vmatprep.mubr.bf16.mxu1 %v1647_v29 }
  0x96   : > { %619 = vmatmul.mubr.bf16.gmra.mrb[12].mxu0 %v1628_v30  ;;  %683 = vmatmul.mubr.bf16.gmra.mrb[12].mxu1 %v1649_v32 }
  0x97   : > { %626 = vmatprep.mubr.bf16.mxu0 %v1632_v31  ;;  %690 = vmatprep.mubr.bf16.mxu1 %v1653_v33 }
  0x9e   : > { %627 = vmatmul.mubr.bf16.gmra.mrb[16].mxu0 %v1634_v34  ;;  %691 = vmatmul.mubr.bf16.gmra.mrb[16].mxu1 %v1655_v36 }
  0x9f   : > { %634 = vmatprep.mubr.bf16.mxu0 %v1638_v35  ;;  %698 = vmatprep.mubr.bf16.mxu1 %v1656_v37 }
  0xa6   : > { %635 = vmatmul.mubr.bf16.gmra.mrb[20].mxu0 %v1640_v38  ;;  %699 = vmatmul.mubr.bf16.gmra.mrb[20].mxu1 %v1658_v40 }
  0xa7   : > { %642 = vmatprep.mubr.bf16.mxu0 %v1644_v39  ;;  %706 = vmatprep.mubr.bf16.mxu1 %v1659_v41 }
  0xae   : > { %643 = vmatmul.mubr.bf16.gmra.mrb[24].mxu0 %v1646_v42  ;;  %707 = vmatmul.mubr.bf16.gmra.mrb[24].mxu1 %v1661_v44 }
  0xaf   : > { %650 = vmatprep.mubr.bf16.mxu0 %v1650_v43  ;;  %714 = vmatprep.mubr.bf16.mxu1 %v1662_v45 }
  0xb6   : > { %651 = vmatmul.mubr.bf16.gmra.mrb[28].mxu0 %v1652_v46  ;;  %715 = vmatmul.mubr.bf16.gmra.mrb[28].mxu1 %v1664_v47 }
 0x151   : > { %v1405_v48 = vpop.f32.mrb[0].mxu0  ;;  %v1453_v50 = vpop.f32.mrb[0].mxu1 }
 0x152   : > { %v1406_v49 = vpop.f32.mrb[1].mxu0  ;;  %v1454_v53 = vpop.f32.mrb[1].mxu1 }
 0x153   : > { %v1407_v51 = vadd.f32 %v1406_v49, %v1405_v48  ;;  %v1408_v52 = vpop.f32.mrb[2].mxu0  ;;  %v2072_v55 = vadd.f32 %v1454_v53, %v1453_v50  ;;  %v1456_v56 = vpop.f32.mrb[2].mxu1 }
 0x154   : > { %v1409_v54 = vpop.f32.mrb[3].mxu0  ;;  %v1457_v58 = vpop.f32.mrb[3].mxu1 }
 0x155   : > { %v1410_v57 = vadd.f32 %v1409_v54, %v1408_v52  ;;  %v2074_v59 = vadd.f32 %v1457_v58, %v1456_v56  ;;  %v920_v60 = vmul.f32 %v1407_v51, %v1407_v51 }
 0x157   : > { %v1297_v61 = vpack.c.bf16 %v1410_v57, %v1407_v51  ;;  %v883_v62 = vadd.f32 %v1410_v57, %v1407_v51  ;;  %v921_v63 = vmul.f32 %v1410_v57, %v1410_v57  ;;  %v1337_v0 = vpack.c.bf16 %v2074_v59, %v2072_v55 }
 0x159   : > { %1298 = vst [vmem:[%s2078_s22] sm:$0xff] %v1297_v61   ;;  %v952_v1 = vadd.f32 %v921_v63, %v920_v60  ;;  %v1411_v2 = vpop.f32.mrb[4].mxu0  ;;  %1381 = vst [vmem:[%s2078_s22 + $0x40] sm:$0xff] %v1337_v0   ;;  %v1459_v4 = vpop.f32.mrb[4].mxu1 }
 0x15a   : > { %v1412_v3 = vpop.f32.mrb[5].mxu0  ;;  %v1460_v7 = vpop.f32.mrb[5].mxu1 }
 0x15b   : > { %v1413_v5 = vadd.f32 %v1412_v3, %v1411_v2  ;;  %v1414_v6 = vpop.f32.mrb[6].mxu0  ;;  %v2082_v9 = vadd.f32 %v1460_v7, %v1459_v4  ;;  %v1462_v10 = vpop.f32.mrb[6].mxu1 }
 0x15c   : > { %v1415_v8 = vpop.f32.mrb[7].mxu0  ;;  %v1463_v14 = vpop.f32.mrb[7].mxu1 }
 0x15d   : > { %v884_v11 = vadd.f32 %v1413_v5, %v883_v62  ;;  %v922_v12 = vmul.f32 %v1413_v5, %v1413_v5  ;;  %v1416_v13 = vadd.f32 %v1415_v8, %v1414_v6  ;;  %v2084_v15 = vadd.f32 %v1463_v14, %v1462_v10 }
 0x15f   : > { %v953_v16 = vadd.f32 %v952_v1, %v922_v12  ;;  %v1302_v17 = vpack.c.bf16 %v1416_v13, %v1413_v5  ;;  %v885_v18 = vadd.f32 %v1416_v13, %v884_v11  ;;  %v923_v19 = vmul.f32 %v1416_v13, %v1416_v13 }
 0x160   : > { %v1342_v20 = vpack.c.bf16 %v2084_v15, %v2082_v9 }
 0x161   : > { %1374 = vst [vmem:[%s2078_s22 + $0x8] sm:$0xff] %v1302_v17   ;;  %v954_v21 = vadd.f32 %v953_v16, %v923_v19  ;;  %v1417_v22 = vpop.f32.mrb[8].mxu0  ;;  %v1465_v24 = vpop.f32.mrb[8].mxu1 }
 0x162   : > { %v1418_v23 = vpop.f32.mrb[9].mxu0  ;;  %1382 = vst [vmem:[%s2078_s22 + $0x48] sm:$0xff] %v1342_v20   ;;  %v1466_v27 = vpop.f32.mrb[9].mxu1 }
 0x163   : > { %v1419_v25 = vadd.f32 %v1418_v23, %v1417_v22  ;;  %v1420_v26 = vpop.f32.mrb[10].mxu0  ;;  %v2090_v29 = vadd.f32 %v1466_v27, %v1465_v24  ;;  %v1468_v30 = vpop.f32.mrb[10].mxu1 }
 0x164   : > { %v1421_v28 = vpop.f32.mrb[11].mxu0  ;;  %v1469_v34 = vpop.f32.mrb[11].mxu1 }
 0x165   : > { %v886_v31 = vadd.f32 %v1419_v25, %v885_v18  ;;  %v924_v32 = vmul.f32 %v1419_v25, %v1419_v25  ;;  %v1422_v33 = vadd.f32 %v1421_v28, %v1420_v26  ;;  %v2092_v35 = vadd.f32 %v1469_v34, %v1468_v30 }
 0x167   : > { %v955_v36 = vadd.f32 %v954_v21, %v924_v32  ;;  %v1307_v37 = vpack.c.bf16 %v1422_v33, %v1419_v25  ;;  %v887_v38 = vadd.f32 %v1422_v33, %v886_v31  ;;  %v925_v39 = vmul.f32 %v1422_v33, %v1422_v33 }
 0x168   : > { %v1347_v40 = vpack.c.bf16 %v2092_v35, %v2090_v29 }
 0x169   : > { %1375 = vst [vmem:[%s2078_s22 + $0x10] sm:$0xff] %v1307_v37   ;;  %v956_v41 = vadd.f32 %v955_v36, %v925_v39  ;;  %v1423_v42 = vpop.f32.mrb[12].mxu0  ;;  %v1471_v44 = vpop.f32.mrb[12].mxu1 }
 0x16a   : > { %v1424_v43 = vpop.f32.mrb[13].mxu0  ;;  %1383 = vst [vmem:[%s2078_s22 + $0x50] sm:$0xff] %v1347_v40   ;;  %v1472_v47 = vpop.f32.mrb[13].mxu1 }
 0x16b   : > { %v1425_v45 = vadd.f32 %v1424_v43, %v1423_v42  ;;  %v1426_v46 = vpop.f32.mrb[14].mxu0  ;;  %v2098_v49 = vadd.f32 %v1472_v47, %v1471_v44  ;;  %v1474_v50 = vpop.f32.mrb[14].mxu1 }
 0x16c   : > { %v1427_v48 = vpop.f32.mrb[15].mxu0  ;;  %v1475_v54 = vpop.f32.mrb[15].mxu1 }
 0x16d   : > { %v888_v51 = vadd.f32 %v1425_v45, %v887_v38  ;;  %v926_v52 = vmul.f32 %v1425_v45, %v1425_v45  ;;  %v1428_v53 = vadd.f32 %v1427_v48, %v1426_v46  ;;  %v2100_v56 = vadd.f32 %v1475_v54, %v1474_v50 }
 0x16f   : > { %v957_v57 = vadd.f32 %v956_v41, %v926_v52  ;;  %v1312_v58 = vpack.c.bf16 %v1428_v53, %v1425_v45  ;;  %v889_v60 = vadd.f32 %v1428_v53, %v888_v51  ;;  %v927_v61 = vmul.f32 %v1428_v53, %v1428_v53 }
 0x170   : > { %v1352_v62 = vpack.c.bf16 %v2100_v56, %v2098_v49 }
 0x171   : > { %1376 = vst [vmem:[%s2078_s22 + $0x18] sm:$0xff] %v1312_v58   ;;  %v958_v63 = vadd.f32 %v957_v57, %v927_v61  ;;  %v1429_v0 = vpop.f32.mrb[16].mxu0  ;;  %v1477_v2 = vpop.f32.mrb[16].mxu1 }
 0x172   : > { %v1430_v1 = vpop.f32.mrb[17].mxu0  ;;  %1384 = vst [vmem:[%s2078_s22 + $0x58] sm:$0xff] %v1352_v62   ;;  %v1478_v5 = vpop.f32.mrb[17].mxu1 }
 0x173   : > { %v1431_v3 = vadd.f32 %v1430_v1, %v1429_v0  ;;  %v1432_v4 = vpop.f32.mrb[18].mxu0  ;;  %v2106_v7 = vadd.f32 %v1478_v5, %v1477_v2  ;;  %v1480_v8 = vpop.f32.mrb[18].mxu1 }
 0x174   : > { %v1433_v6 = vpop.f32.mrb[19].mxu0  ;;  %v1481_v13 = vpop.f32.mrb[19].mxu1 }
 0x175   : > { %v890_v10 = vadd.f32 %v1431_v3, %v889_v60  ;;  %v928_v11 = vmul.f32 %v1431_v3, %v1431_v3  ;;  %v1434_v12 = vadd.f32 %v1433_v6, %v1432_v4  ;;  %v2108_v14 = vadd.f32 %v1481_v13, %v1480_v8 }
 0x177   : > { %v959_v16 = vadd.f32 %v958_v63, %v928_v11  ;;  %v1317_v17 = vpack.c.bf16 %v1434_v12, %v1431_v3  ;;  %v891_v18 = vadd.f32 %v1434_v12, %v890_v10  ;;  %v929_v19 = vmul.f32 %v1434_v12, %v1434_v12 }
 0x178   : > { %v1357_v20 = vpack.c.bf16 %v2108_v14, %v2106_v7 }
 0x179   : > { %1377 = vst [vmem:[%s2078_s22 + $0x20] sm:$0xff] %v1317_v17   ;;  %v960_v21 = vadd.f32 %v959_v16, %v929_v19  ;;  %v1435_v22 = vpop.f32.mrb[20].mxu0  ;;  %v1483_v24 = vpop.f32.mrb[20].mxu1 }
 0x17a   : > { %v1436_v23 = vpop.f32.mrb[21].mxu0  ;;  %1385 = vst [vmem:[%s2078_s22 + $0x60] sm:$0xff] %v1357_v20   ;;  %v1484_v27 = vpop.f32.mrb[21].mxu1 }
 0x17b   : > { %v1437_v25 = vadd.f32 %v1436_v23, %v1435_v22  ;;  %v1438_v26 = vpop.f32.mrb[22].mxu0  ;;  %v2114_v30 = vadd.f32 %v1484_v27, %v1483_v24  ;;  %v1486_v31 = vpop.f32.mrb[22].mxu1  ;;  %v936_v27 = vmul.f32 %v2072_v55, %v2072_v55 }
 0x17c   : > { %v1439_v28 = vpop.f32.mrb[23].mxu0  ;;  %v1487_v36 = vpop.f32.mrb[23].mxu1 }
 0x17d   : > { %v892_v32 = vadd.f32 %v1437_v25, %v891_v18  ;;  %v930_v33 = vmul.f32 %v1437_v25, %v1437_v25  ;;  %v1440_v34 = vadd.f32 %v1439_v28, %v1438_v26  ;;  %v2116_v37 = vadd.f32 %v1487_v36, %v1486_v31 }
 0x17f   : > { %v961_v38 = vadd.f32 %v960_v21, %v930_v33  ;;  %v1322_v39 = vpack.c.bf16 %v1440_v34, %v1437_v25  ;;  %v893_v40 = vadd.f32 %v1440_v34, %v892_v32  ;;  %v931_v41 = vmul.f32 %v1440_v34, %v1440_v34 }
 0x180   : > { %v1362_v42 = vpack.c.bf16 %v2116_v37, %v2114_v30  ;;  %v937_v32 = vmul.f32 %v2074_v59, %v2074_v59 }
 0x181   : > { %1378 = vst [vmem:[%s2078_s22 + $0x28] sm:$0xff] %v1322_v39   ;;  %v962_v43 = vadd.f32 %v961_v38, %v931_v41  ;;  %v1441_v44 = vpop.f32.mrb[24].mxu0  ;;  %v1489_v46 = vpop.f32.mrb[24].mxu1 }
 0x182   : > { %v1442_v45 = vpop.f32.mrb[25].mxu0  ;;  %1386 = vst [vmem:[%s2078_s22 + $0x68] sm:$0xff] %v1362_v42   ;;  %v1490_v50 = vpop.f32.mrb[25].mxu1 }
 0x183   : > { %v1443_v47 = vadd.f32 %v1442_v45, %v1441_v44  ;;  %v1444_v48 = vpop.f32.mrb[26].mxu0  ;;  %v2122_v52 = vadd.f32 %v1490_v50, %v1489_v46  ;;  %v1492_v53 = vpop.f32.mrb[26].mxu1 }
 0x184   : > { %v1445_v51 = vpop.f32.mrb[27].mxu0  ;;  %v1493_v60 = vpop.f32.mrb[27].mxu1 }
 0x185   : > { %v894_v54 = vadd.f32 %v1443_v47, %v893_v40  ;;  %v932_v57 = vmul.f32 %v1443_v47, %v1443_v47  ;;  %v1446_v58 = vadd.f32 %v1445_v51, %v1444_v48  ;;  %v2124_v61 = vadd.f32 %v1493_v60, %v1492_v53 }
 0x187   : > { %v963_v62 = vadd.f32 %v962_v43, %v932_v57  ;;  %v1327_v63 = vpack.c.bf16 %v1446_v58, %v1443_v47  ;;  %v895_v0 = vadd.f32 %v1446_v58, %v894_v54  ;;  %v933_v1 = vmul.f32 %v1446_v58, %v1446_v58 }
 0x188   : > { %v1367_v2 = vpack.c.bf16 %v2124_v61, %v2122_v52 }
 0x189   : > { %1379 = vst [vmem:[%s2078_s22 + $0x30] sm:$0xff] %v1327_v63   ;;  %v964_v3 = vadd.f32 %v963_v62, %v933_v1  ;;  %v1447_v4 = vpop.f32.mrb[28].mxu0  ;;  %v1495_v6 = vpop.f32.mrb[28].mxu1 }
 0x18a   : > { %v1448_v5 = vpop.f32.mrb[29].mxu0  ;;  %1387 = vst [vmem:[%s2078_s22 + $0x70] sm:$0xff] %v1367_v2   ;;  %v1496_v11 = vpop.f32.mrb[29].mxu1 }
 0x18b   : > { %v1449_v8 = vadd.f32 %v1448_v5, %v1447_v4  ;;  %v1450_v10 = vpop.f32.mrb[30].mxu0  ;;  %v2130_v13 = vadd.f32 %v1496_v11, %v1495_v6  ;;  %v1498_v16 = vpop.f32.mrb[30].mxu1 }
 0x18c   : > { %v1451_v12 = vpop.f32.mrb[31].mxu0  ;;  %v1499_v20 = vpop.f32.mrb[31].mxu1 }
 0x18d   : > { %v896_v17 = vadd.f32 %v1449_v8, %v895_v0  ;;  %v934_v18 = vmul.f32 %v1449_v8, %v1449_v8  ;;  %v1452_v19 = vadd.f32 %v1451_v12, %v1450_v10  ;;  %v2134_v21 = vadd.f32 %v1499_v20, %v1498_v16 }
 0x18f   : > { %v965_v22 = vadd.f32 %v964_v3, %v934_v18  ;;  %v1332_v23 = vpack.c.bf16 %v1452_v19, %v1449_v8  ;;  %v897_v24 = vadd.f32 %v1452_v19, %v896_v17  ;;  %v935_v25 = vmul.f32 %v1452_v19, %v1452_v19 }
 0x190   : > { %v1372_v26 = vpack.c.bf16 %v2134_v21, %v2130_v13 }
 0x191   : > { %1380 = vst [vmem:[%s2078_s22 + $0x38] sm:$0xff] %v1332_v23   ;;  %v898_v28 = vadd.f32 %v2072_v55, %v897_v24  ;;  %v966_v31 = vadd.f32 %v965_v22, %v935_v25 }
 0x192   : > { %1388 = vst [vmem:[%s2078_s22 + $0x78] sm:$0xff] %v1372_v26  }
 0x193   : > { %v899_v33 = vadd.f32 %v2074_v59, %v898_v28  ;;  %v967_v34 = vadd.f32 %v966_v31, %v936_v27 }
 0x194   : > { %1736 = shalt.err (!%p1733_p5)
}
 0x195   : > { %s1737_s25 = scalar_lea.hbm %s2139_s18, 2048  ;;  %s1741_s6 = scalar_lea.hbm %s2275_s2, 4096 }
 0x196   : > { %p1738_p9 = scmp.ne.s32.totalorder %s2139_s18, %s1737_s25  ;;  %p1742_p3 = scmp.lt.u32.totalorder %s2139_s18, %s2275_s2 }
 0x197   : > { %p1743_p7 = scmp.lt.u32.totalorder %s1741_s6, %s1737_s25  ;;  %p1745_p4 = scmp.lt.u32.totalorder %s1737_s25, %s2139_s18 }
 0x198   : > { %p1739_p1 = pnand %p1738_p9, %p1969_p10 }
 0x199   : > { %p1744_p13 = por %p1743_p7, %p1742_p3 }
 0x19a   : > { %p1740_p2 = pneg %p1739_p1 }
 0x19b   : > { %p1746_p6 = por %p1745_p4, %p1744_p13 }
 0x19d   : > { %p1747_p8 = pnand %p1746_p6, %p1740_p2 }
 0x19f   : > { %1750 = shalt.err (!%p1747_p8)
}
 0x1a0   : > { %s1850_s24 = smov 64   ;;  %s1851_s10 = smov 4   ;;  %v938_v55 = vmul.f32 %v2082_v9, %v2082_v9  ;;  %v900_v59 = vadd.f32 %v2082_v9, %v899_v33  ;;  %v968_v36 = vadd.f32 %v967_v34, %v937_v32  ;;  %v939_v38 = vmul.f32 %v2084_v15, %v2084_v15 }
 0x1a1   : > { %1523 = dma.vmem_to_hbm [thread:$0]  (%p1969_p10), %s2141_s9, 2048, %s2139_s18, %s997_s26, %s1850_s24, %s1850_s24, %s1851_s10   ;;  %v940_v41 = vmul.f32 %v2090_v29, %v2090_v29  ;;  %v941_v44 = vmul.f32 %v2092_v35, %v2092_v35  ;;  %v942_v9 = vmul.f32 %v2098_v49, %v2098_v49  ;;  %v944_v53 = vmul.f32 %v2106_v7, %v2106_v7 }
 0x1a2   : > { %v901_v39 = vadd.f32 %v2084_v15, %v900_v59  ;;  %v969_v40 = vadd.f32 %v968_v36, %v938_v55  ;;  %v943_v15 = vmul.f32 %v2100_v56, %v2100_v56  ;;  %v945_v58 = vmul.f32 %v2108_v14, %v2108_v14  ;;  %s1171_s9 = sshll.u32 %s2025_s27, 1  ;;  %s1256_s11 = sshll.u32 %s1833_s15, 5 }
 0x1a3   : > { %v946_v62 = vmul.f32 %v2114_v30, %v2114_v30  ;;  %v947_v0 = vmul.f32 %v2116_v37, %v2116_v37  ;;  %v948_v2 = vmul.f32 %v2122_v52, %v2122_v52  ;;  %v949_v4 = vmul.f32 %v2124_v61, %v2124_v61  ;;  %s238_s18 = scalar_lea.vmem [#allocation8], %s1171_s9  ;;  %s2224_s21 = scalar_lea.hbm %s2276_s3, %s1256_s11 }
 0x1a4   : > { %v970_v42 = vadd.f32 %v969_v40, %v939_v38  ;;  %v902_v43 = vadd.f32 %v2090_v29, %v901_v39  ;;  %v989_v17 = vlaneseq  ;;  %s1033_s26 = sshll.u32 %s238_s18, 4  ;;  %s1002_s19 = scalar_lea.sflag [#allocation9], %s2025_s27  ;;  %s2226_s26 = int_to_ptr.vmem [resolvable:$true] %s1033_s26 }
 0x1a5   : > { %s1751_s25 = scalar_lea.vmem %s2226_s26, 32  ;;  %s1852_s15 = smov [#allocation8]  }
 0x1a6   : > { %v903_v45 = vadd.f32 %v2092_v35, %v902_v43  ;;  %v971_v46 = vadd.f32 %v970_v42, %v940_v41  ;;  %v990_v22 = vshrl.u32 %v989_v17, 7  ;;  %p1752_p12 = scmp.ne.s32.totalorder %s2226_s26, %s1751_s25  ;;  %s1755_s29 = sshll.u32 %s1852_s15, 4  ;;  %s1756_s29 = int_to_ptr.vmem [resolvable:$false] %s1755_s29 }
 0x1a7   : > { %s1757_s4 = scalar_lea.vmem %s1756_s29, 64  ;;  %p1758_p5 = scmp.lt.s32.totalorder %s2226_s26, %s1756_s29 }
 0x1a8   : > { %v904_v47 = vadd.f32 %v2098_v49, %v903_v45  ;;  %v972_v48 = vadd.f32 %v971_v46, %v941_v44  ;;  %vm991_vm0 = vcmp.eq.s32.totalorder %v990_v22, 0  ;;  %p1753_p11 = pnand %p1752_p12, %p1969_p10  ;;  %p1759_p9 = scmp.lt.s32.totalorder %s1757_s4, %s1751_s25 }
 0x1aa   : > { %v905_v50 = vadd.f32 %v2100_v56, %v904_v47  ;;  %v973_v51 = vadd.f32 %v972_v48, %v942_v9  ;;  %p1754_p0 = pneg %p1753_p11  ;;  %p1760_p1 = por %p1759_p9, %p1758_p5 }
 0x1ac   : > { %v906_v29 = vadd.f32 %v2106_v7, %v905_v50  ;;  %v974_v54 = vadd.f32 %v973_v51, %v943_v15  ;;  %p1761_p2 = pnand %p1760_p1, %p1754_p0 }
 0x1ae   : > { %v975_v35 = vadd.f32 %v974_v54, %v944_v53  ;;  %v907_v57 = vadd.f32 %v2108_v14, %v906_v29 }
 0x1b0   : > { %v976_v49 = vadd.f32 %v975_v35, %v945_v58  ;;  %v908_v60 = vadd.f32 %v2114_v30, %v907_v57  ;;  %v950_v30 = vmul.f32 %v2130_v13, %v2130_v13 }
 0x1b2   : > { %v977_v56 = vadd.f32 %v976_v49, %v946_v62  ;;  %v909_v63 = vadd.f32 %v2116_v37, %v908_v60 }
 0x1b4   : > { %v978_v7 = vadd.f32 %v977_v56, %v947_v0  ;;  %v910_v1 = vadd.f32 %v2122_v52, %v909_v63  ;;  %v951_v52 = vmul.f32 %v2134_v21, %v2134_v21 }
 0x1b6   : > { %v979_v3 = vadd.f32 %v978_v7, %v948_v2  ;;  %v911_v14 = vadd.f32 %v2124_v61, %v910_v1 }
 0x1b8   : > { %v980_v5 = vadd.f32 %v979_v3, %v949_v4  ;;  %v912_v6 = vadd.f32 %v2130_v13, %v911_v14 }
 0x1ba   : > { %v981_v37 = vadd.f32 %v980_v5, %v950_v30  ;;  %v913_v8 = vadd.f32 %v2134_v21, %v912_v6 }
 0x1bc   : > { %v914_v10 = vrot.slane %v913_v8, 4  ;;  %v982_v11 = vadd.f32 %v981_v37, %v951_v52 }
 0x1be   : > { %v915_v12 = vadd.f32 %v914_v10, %v913_v8  ;;  %v983_v16 = vrot.slane %v982_v11, 4 }
 0x1c0   : > { %v916_v18 = vrot.slane %v915_v12, 2  ;;  %v984_v61 = vadd.f32 %v983_v16, %v982_v11 }
 0x1c2   : > { %v917_v19 = vadd.f32 %v916_v18, %v915_v12  ;;  %v985_v20 = vrot.slane %v984_v61, 2 }
 0x1c4   : > { %v918_v13 = vrot.slane %v917_v19, 1  ;;  %v986_v23 = vadd.f32 %v985_v20, %v984_v61 }
 0x1c6   : > { %v987_v24 = vrot.slane %v986_v23, 1  ;;  %v919_v21 = vadd.f32 %v918_v13, %v917_v19 }
 0x1c8   : > { %v988_v25 = vadd.f32 %v987_v24, %v986_v23 }
 0x1ca   : > { %v994_v26 = vsel %vm991_vm0, %v919_v21, %v988_v25 }
 0x1cb   : > { %995 = vst [vmem:[%s238_s18] sm:$0x3] %v994_v26 }
 0x1cc   : > { %1764 = shalt.err (!%p1761_p2)
}
 0x1cd   : > { %s1765_s27 = scalar_lea.hbm %s2224_s21, 32  ;;  %s1769_s22 = scalar_lea.hbm %s2276_s3, 64 }
 0x1ce   : > { %p1766_p3 = scmp.ne.s32.totalorder %s2224_s21, %s1765_s27  ;;  %p1770_p4 = scmp.lt.u32.totalorder %s2224_s21, %s2276_s3 }
 0x1cf   : > { %p1771_p6 = scmp.lt.u32.totalorder %s1769_s22, %s1765_s27  ;;  %p1773_p12 = scmp.lt.u32.totalorder %s1765_s27, %s2224_s21 }
 0x1d0   : > { %p1767_p7 = pnand %p1766_p3, %p1969_p10 }
 0x1d1   : > { %p1772_p8 = por %p1771_p6, %p1770_p4 }
 0x1d2   : > { %p1768_p13 = pneg %p1767_p7 }
 0x1d3   : > { %p1774_p11 = por %p1773_p12, %p1772_p8 }
 0x1d5   : > { %p1775_p0 = pnand %p1774_p11, %p1768_p13 }
 0x1d7   : > { %1778 = shalt.err (!%p1775_p0)
}
 0x1d8   : > { %1524 = dma.vmem_to_hbm [thread:$0]  (%p1969_p10), %s2226_s26, 32, %s2224_s21, %s1002_s19  }
 0x1d9 PF: > { %s1045_s9 = sand.u32 1, %s1821_s12   ;;  %p2294_p5 = scmp.ne.s32.totalorder %s2284_s23, 0 }
 0x1da   : > { %p2295_p9 = scmp.ge.s32.totalorder %s1841_s17, 2  ;;  %s1046_s11 = scalar_lea.sflag [#allocation4], %s1045_s9 }
 0x1dc   : > { %p1536_p1 = pnand %p2295_p9, %p2294_p5 }
 0x1de   : > { %1812 = dma.done.wait (!%p1536_p1), %s1046_s11, 2048  }
 0x1df   : > { %1814 = vsyncadd (!%p1536_p1), %s1046_s11, 4294965248  ;;  %s1055_s18 = scalar_lea.sflag [#allocation9], %s1045_s9 }
 0x1e0   : > { %1816 = dma.done.wait (!%p1536_p1), %s1055_s18, 32  }
 0x1e1   : > { %1818 = vsyncadd (!%p1536_p1), %s1055_s18, 4294967264  ;;  %s24_s17 = sadd.s32 1, %s1841_s17   ;;  %s2296_s12 = smov %s1825_s13 }
 0x1e2   : > { %p21_p2 = scmp.ge.s32.totalorder %s24_s17, 4   ;;  %s2297_s13 = smov %s1829_s14 }
 0x1e3   : > { %s2298_s14 = smov %s1978_s5  ;;  %s2299_s15 = smov %s1837_s16 }
 0x1e4   : > { %s2300_s16 = smov %s2302_s28  ;;  %23 = sbr.rel (!%p21_p2) target bundleno = 9 (0x9), region = 95 }
 0x1eb   :  { %1060 = vsyncpa [#allocation3], 1 }
 0x1ec   :  { %1062 = vsyncpa [#allocation3 + $0x1], 1 }
 0x1ed   :  { %1063 = vsyncpa [#allocation6], 1 }
 0x1ee   :  { %1064 = vsyncpa [#allocation4], 1 }
 0x1ef   :  { %1066 = vsyncpa [#allocation4 + $0x1], 1 }
 0x1f0   :  { %1067 = vsyncpa [#allocation9], 1 }
 0x1f1   :  { %1069 = vsyncpa [#allocation9 + $0x1], 1 }

</bundles_post_ra>
